<compile_context>
chip_gen: v5e
topology: v5e:2x2
jax: 0.10.0
libtpu: 0.0.40
codegen_flags: <defaults>
</compile_context>

<pallas_src>
import functools

import jax
import jax.numpy as jnp
from jax.experimental import pallas as pl
from jax.experimental.pallas import tpu as pltpu


def _fused_kernel(seq_ref, img_ref, *refs, num_layers, seq_dim):
    """seq_ref:[TB,Ds] img_ref:[TB,Di]; params: W0_seq, W0_img, b0, (W_i, b_i)...; out_ref last.

    Remainder batch tiles (B % TB != 0) run the MLP on padded rows too; those
    rows are never written back, so this is benign -- do not add a mask.
    """
    out_ref = refs[-1]
    params = refs[:-1]

    seq = seq_ref[...]
    img = img_ref[...]

    # Layer 0: split-weight matmul replaces cat((seq, img), dim=1) @ W0.
    # Native-dtype operands -> fast MXU path; accumulate in f32.
    h = jnp.dot(seq, params[0][...], preferred_element_type=jnp.float32)
    h = h + jnp.dot(img, params[1][...], preferred_element_type=jnp.float32)
    h = jnp.maximum(h + params[2][...].astype(jnp.float32), 0.0)  # relu; dropout=None -> no-op

    # Remaining Linear -> ReLU blocks.
    idx = 3
    for _ in range(1, num_layers):
        w = params[idx][...]
        b = params[idx + 1][...]
        idx += 2
        # Feed the accumulator to the next matmul in the weight's dtype
        # (no-op cast for f32 weights, single downcast for bf16 weights).
        h = jnp.dot(h.astype(w.dtype), w, preferred_element_type=jnp.float32)
        h = jnp.maximum(h + b.astype(jnp.float32), 0.0)

    # Fused retain-cat: [ seq | MLP(cat(seq, img)) ] written in one pass.
    out_ref[:, :seq_dim] = seq.astype(out_ref.dtype)
    out_ref[:, seq_dim:] = h.astype(out_ref.dtype)
    # TODO(synk): if dnn_norm_type='bn'/'in' is required, apply the per-feature
    # normalization to the full [TB, seq_dim+h_out] block here (None -> identity).


def dnn_cat_ret_cat_fusion(seq_features, img_features, weights, biases, *, batch_tile=8192):
    """weights[i]: [in_i, out_i] (already transposed from torch), biases[i]: [1, out_i]."""
    num_layers = len(weights)
    B, seq_dim = seq_features.shape
    _, img_dim = img_features.shape
    h_out = weights[-1].shape[1]
    out_dim = seq_dim + h_out
    out_dtype = seq_features.dtype

    # Pre-split the first weight so the kernel never concatenates along lanes.
    w0 = weights[0]
    params = [w0[:seq_dim, :], w0[seq_dim:, :], biases[0]]
    for w, b in zip(weights[1:], biases[1:]):
        params += [w, b]

    # Batch tile: large to amortize per-step overhead, but aim for >=2 grid steps
    # (when B allows) so v7x's two TensorCores both get a share of the batch.
    tb = min(batch_tile, max(8, ((pl.cdiv(B, 2) + 7) // 8) * 8))
    if tb >= B:
        tb = B  # single full-batch block (block == full array dim is always legal)
    grid = (pl.cdiv(B, tb),)

    def row_spec(dim):
        return pl.BlockSpec((tb, dim), lambda i: (i, 0))

    def resident_spec(shape):
        # Constant index_map -> stays in VMEM across all grid steps (no re-DMA).
        return pl.BlockSpec(shape, lambda i: (0, 0))

    in_specs = [row_spec(seq_dim), row_spec(img_dim)] + [resident_spec(p.shape) for p in params]
    out_spec = pl.BlockSpec((tb, out_dim), lambda i: (i, 0))

    # Advisory cost estimate (mem-bound kernel, single HBM pass after the fusion).
    dims = [seq_dim + img_dim] + [w.shape[1] for w in weights]
    flops = int(sum(2 * B * dims[i] * dims[i + 1] for i in range(num_layers)))
    in_itemsize = jnp.dtype(seq_features.dtype).itemsize
    out_itemsize = jnp.dtype(out_dtype).itemsize
    bytes_accessed = int(
        B * (seq_dim + img_dim) * in_itemsize
        + B * out_dim * out_itemsize
        + sum(int(p.size) * jnp.dtype(p.dtype).itemsize for p in params)
    )

    kernel = functools.partial(_fused_kernel, num_layers=num_layers, seq_dim=seq_dim)

    out = pl.pallas_call(
        kernel,
        out_shape=jax.ShapeDtypeStruct((B, out_dim), out_dtype),
        grid=grid,
        in_specs=in_specs,
        out_specs=out_spec,
        compiler_params=pltpu.CompilerParams(
            dimension_semantics=("parallel",),
            vmem_limit_bytes=32 * 1024 * 1024,
        ),
        cost_estimate=pl.CostEstimate(
            flops=flops, transcendentals=0, bytes_accessed=bytes_accessed),
    )(seq_features, img_features, *params)
    # dnn_norm_type=None -> buildNormalization returns identity (no-op).
    return out


def _reference(seq, img, weights, biases):
    h = jnp.concatenate([seq, img], axis=1)
    for w, b in zip(weights, biases):
        h = jnp.maximum(h @ w + b, 0.0)
    return jnp.concatenate([seq, h], axis=1)


if __name__ == "__main__":
    # Config (consistent with the module's __init__):
    #   feature_dims={'seq': 8}, img feature dim = 24  -> input_dim = 32
    #   dnn_hidden_dims=[64, 32], dnn_activations=['relu','relu'],
    #   dnn_dropouts=[None, None], dnn_norm_type=None
    seq_dim = 8
    img_dim = 24
    input_dim = seq_dim + img_dim
    hidden_dims = [64, 32]

    key = jax.random.PRNGKey(0)
    k_seq, k_img, k_seq2, k_img2, *k_params = jax.random.split(key, 4 + 2 * len(hidden_dims))

    # Deterministic Linear params, torch-style uniform(-1/sqrt(in), 1/sqrt(in)).
    weights, biases = [], []
    dims = [input_dim] + hidden_dims
    for i in range(len(hidden_dims)):
        fan_in, fan_out = dims[i], dims[i + 1]
        bound = 1.0 / (fan_in ** 0.5)
        w = jax.random.uniform(k_params[2 * i], (fan_in, fan_out),
                               minval=-bound, maxval=bound, dtype=jnp.float32)
        b = jax.random.uniform(k_params[2 * i + 1], (1, fan_out),
                               minval=-bound, maxval=bound, dtype=jnp.float32)
        weights.append(w)
        biases.append(b)

    # --- Case 1: small batch (single full-batch block), f32. ---
    B = 2
    seq_features = jax.random.normal(k_seq, (B, seq_dim), dtype=jnp.float32)
    img_features = jax.random.normal(k_img, (B, img_dim), dtype=jnp.float32)
    out = jax.block_until_ready(
        dnn_cat_ret_cat_fusion(seq_features, img_features, weights, biases))
    ref = _reference(seq_features, img_features, weights, biases)
    assert out.shape == (B, seq_dim + hidden_dims[-1]), out.shape
    assert jnp.allclose(out, ref, atol=1e-5, rtol=1e-5), "f32 small-batch mismatch"

    # --- Case 2: multi-tile grid (>=2 steps, remainder tile), f32. ---
    B2 = 100
    seq2 = jax.random.normal(k_seq2, (B2, seq_dim), dtype=jnp.float32)
    img2 = jax.random.normal(k_img2, (B2, img_dim), dtype=jnp.float32)
    out2 = jax.block_until_ready(dnn_cat_ret_cat_fusion(seq2, img2, weights, biases))
    ref2 = _reference(seq2, img2, weights, biases)
    assert out2.shape == (B2, seq_dim + hidden_dims[-1]), out2.shape
    assert jnp.allclose(out2, ref2, atol=1e-5, rtol=1e-5), "f32 multi-tile mismatch"

    # --- Case 3: bf16 streaming (halved HBM traffic), f32 accumulation. ---
    bf = lambda t: t.astype(jnp.bfloat16)
    w_bf = [bf(w) for w in weights]
    b_bf = [bf(b) for b in biases]
    out_bf = jax.block_until_ready(
        dnn_cat_ret_cat_fusion(bf(seq2), bf(img2), w_bf, b_bf))
    assert out_bf.dtype == jnp.bfloat16, out_bf.dtype
    ref_bf = _reference(bf(seq2).astype(jnp.float32), bf(img2).astype(jnp.float32),
                        [w.astype(jnp.float32) for w in w_bf],
                        [b.astype(jnp.float32) for b in b_bf])
    assert jnp.allclose(out_bf.astype(jnp.float32), ref_bf, atol=5e-2, rtol=5e-2), \
        "bf16 streaming mismatch"

    print("KERNEL_OK")
</pallas_src>

<mosaic_0001>
module attributes {stable_mosaic.version = 11 : i64} {
  func.func @_fused_kernel(%arg0: i32, %arg1: memref<2x8xf32, #tpu.memory_space<vmem>>, %arg2: memref<2x24xf32, #tpu.memory_space<vmem>>, %arg3: memref<8x64xf32, #tpu.memory_space<vmem>>, %arg4: memref<24x64xf32, #tpu.memory_space<vmem>>, %arg5: memref<1x64xf32, #tpu.memory_space<vmem>>, %arg6: memref<64x32xf32, #tpu.memory_space<vmem>>, %arg7: memref<1x32xf32, #tpu.memory_space<vmem>>, %arg8: memref<2x40xf32, #tpu.memory_space<vmem>>) attributes {dimension_semantics = [#tpu.dimension_semantics<parallel>], iteration_bounds = array<i64: 1>, scalar_prefetch = 0 : i64, scratch_operands = 0 : i64, tpu.core_type = #tpu.core_type<tc>, window_params = [{transform_indices = @transform_0, window_bounds = array<i64: 2, 8>}, {transform_indices = @transform_1, window_bounds = array<i64: 2, 24>}, {pipeline_mode = #tpu.pipeline_mode<synchronous>, transform_indices = @transform_2, window_bounds = array<i64: 8, 64>}, {pipeline_mode = #tpu.pipeline_mode<synchronous>, transform_indices = @transform_3, window_bounds = array<i64: 24, 64>}, {pipeline_mode = #tpu.pipeline_mode<synchronous>, transform_indices = @transform_4, window_bounds = array<i64: 1, 64>}, {pipeline_mode = #tpu.pipeline_mode<synchronous>, transform_indices = @transform_5, window_bounds = array<i64: 64, 32>}, {pipeline_mode = #tpu.pipeline_mode<synchronous>, transform_indices = @transform_6, window_bounds = array<i64: 1, 32>}, {transform_indices = @transform_7, window_bounds = array<i64: 2, 40>}]} {
    %c0 = arith.constant 0 : index
    %c0_0 = arith.constant 0 : index
    %0 = vector.load %arg1[%c0, %c0_0] : memref<2x8xf32, #tpu.memory_space<vmem>>, vector<2x8xf32>
    %c0_1 = arith.constant 0 : index
    %c0_2 = arith.constant 0 : index
    %1 = vector.load %arg2[%c0_1, %c0_2] : memref<2x24xf32, #tpu.memory_space<vmem>>, vector<2x24xf32>
    %c0_3 = arith.constant 0 : index
    %c0_4 = arith.constant 0 : index
    %2 = vector.load %arg3[%c0_3, %c0_4] : memref<8x64xf32, #tpu.memory_space<vmem>>, vector<8x64xf32>
    %cst = arith.constant dense<0.000000e+00> : vector<2x64xf32>
    %3 = tpu.matmul %0, %2, %cst {dimension_numbers = #tpu.dot_dimension_numbers<[1], [0], [0], [1], [0, 0, 1, 1], [], []>} : vector<2x8xf32>, vector<8x64xf32>, vector<2x64xf32> -> vector<2x64xf32>
    %c0_5 = arith.constant 0 : index
    %c0_6 = arith.constant 0 : index
    %4 = vector.load %arg4[%c0_5, %c0_6] : memref<24x64xf32, #tpu.memory_space<vmem>>, vector<24x64xf32>
    %cst_7 = arith.constant dense<0.000000e+00> : vector<2x64xf32>
    %5 = tpu.matmul %1, %4, %cst_7 {dimension_numbers = #tpu.dot_dimension_numbers<[1], [0], [0], [1], [0, 0, 1, 1], [], []>} : vector<2x24xf32>, vector<24x64xf32>, vector<2x64xf32> -> vector<2x64xf32>
    %6 = arith.addf %3, %5 : vector<2x64xf32>
    %c0_8 = arith.constant 0 : index
    %c0_9 = arith.constant 0 : index
    %7 = vector.load %arg5[%c0_8, %c0_9] : memref<1x64xf32, #tpu.memory_space<vmem>>, vector<1x64xf32>
    %8 = vector.broadcast %7 : vector<1x64xf32> to vector<2x64xf32>
    %9 = arith.addf %6, %8 : vector<2x64xf32>
    %cst_10 = arith.constant 0.000000e+00 : f32
    %10 = vector.broadcast %cst_10 : f32 to vector<2x64xf32>
    %11 = arith.maximumf %9, %10 : vector<2x64xf32>
    %c0_11 = arith.constant 0 : index
    %c0_12 = arith.constant 0 : index
    %12 = vector.load %arg6[%c0_11, %c0_12] : memref<64x32xf32, #tpu.memory_space<vmem>>, vector<64x32xf32>
    %c0_13 = arith.constant 0 : index
    %c0_14 = arith.constant 0 : index
    %13 = vector.load %arg7[%c0_13, %c0_14] : memref<1x32xf32, #tpu.memory_space<vmem>>, vector<1x32xf32>
    %cst_15 = arith.constant dense<0.000000e+00> : vector<2x32xf32>
    %14 = tpu.matmul %11, %12, %cst_15 {dimension_numbers = #tpu.dot_dimension_numbers<[1], [0], [0], [1], [0, 0, 1, 1], [], []>} : vector<2x64xf32>, vector<64x32xf32>, vector<2x32xf32> -> vector<2x32xf32>
    %15 = vector.broadcast %13 : vector<1x32xf32> to vector<2x32xf32>
    %16 = arith.addf %14, %15 : vector<2x32xf32>
    %cst_16 = arith.constant 0.000000e+00 : f32
    %17 = vector.broadcast %cst_16 : f32 to vector<2x32xf32>
    %18 = arith.maximumf %16, %17 : vector<2x32xf32>
    %c0_17 = arith.constant 0 : index
    %c0_18 = arith.constant 0 : index
    %19 = vector.load %arg8[%c0_17, %c0_18] : memref<2x40xf32, #tpu.memory_space<vmem>>, vector<2x8xf32>
    tpu.vector_store %arg8[%c0_17, %c0_18], %0 {strides = array<i32>} : memref<2x40xf32, #tpu.memory_space<vmem>>, vector<2x8xf32>,
    %c0_19 = arith.constant 0 : index
    %c8 = arith.constant 8 : index
    %20 = vector.load %arg8[%c0_19, %c8] : memref<2x40xf32, #tpu.memory_space<vmem>>, vector<2x32xf32>
    tpu.vector_store %arg8[%c0_19, %c8], %18 {strides = array<i32>} : memref<2x40xf32, #tpu.memory_space<vmem>>, vector<2x32xf32>,
    return
  }
  func.func @transform_0(%arg0: i32) -> (i32, i32) {
    %c0_i32 = arith.constant 0 : i32
    %c0_i32_0 = arith.constant 0 : i32
    return %arg0, %c0_i32 : i32, i32
  }
  func.func @transform_1(%arg0: i32) -> (i32, i32) {
    %c0_i32 = arith.constant 0 : i32
    %c0_i32_0 = arith.constant 0 : i32
    return %arg0, %c0_i32 : i32, i32
  }
  func.func @transform_2(%arg0: i32) -> (i32, i32) {
    %c0_i32 = arith.constant 0 : i32
    %c0_i32_0 = arith.constant 0 : i32
    %c0_i32_1 = arith.constant 0 : i32
    return %c0_i32, %c0_i32_0 : i32, i32
  }
  func.func @transform_3(%arg0: i32) -> (i32, i32) {
    %c0_i32 = arith.constant 0 : i32
    %c0_i32_0 = arith.constant 0 : i32
    %c0_i32_1 = arith.constant 0 : i32
    return %c0_i32, %c0_i32_0 : i32, i32
  }
  func.func @transform_4(%arg0: i32) -> (i32, i32) {
    %c0_i32 = arith.constant 0 : i32
    %c0_i32_0 = arith.constant 0 : i32
    %c0_i32_1 = arith.constant 0 : i32
    return %c0_i32, %c0_i32_0 : i32, i32
  }
  func.func @transform_5(%arg0: i32) -> (i32, i32) {
    %c0_i32 = arith.constant 0 : i32
    %c0_i32_0 = arith.constant 0 : i32
    %c0_i32_1 = arith.constant 0 : i32
    return %c0_i32, %c0_i32_0 : i32, i32
  }
  func.func @transform_6(%arg0: i32) -> (i32, i32) {
    %c0_i32 = arith.constant 0 : i32
    %c0_i32_0 = arith.constant 0 : i32
    %c0_i32_1 = arith.constant 0 : i32
    return %c0_i32, %c0_i32_0 : i32, i32
  }
  func.func @transform_7(%arg0: i32) -> (i32, i32) {
    %c0_i32 = arith.constant 0 : i32
    %c0_i32_0 = arith.constant 0 : i32
    return %arg0, %c0_i32 : i32, i32
  }
}

</mosaic_0001>

<bundles_post_ra>
// kernel: tpu_custom_call.1
= control target key start
LH: loop header
LB: loop body
LE: loop exit
PB: predicated region body
PF: predicated region fallthrough
CT: control target
= control target key end

     0   :  { %vm57_vm0 = vcmask 64512   ;;  %vm124_vm1 = vcmask 58368   ;;  %vm33_vm2 = vcmask 195584   ;;  %s274_s0 = inlined_call_operand.vmem [shape: f32[2,8], index: 0, kind: input, shape index: {}]   ;;  %s275_s1 = inlined_call_operand.vmem [shape: f32[2,24], index: 1, kind: input, shape index: {}]   ;;  %s276_s2 = inlined_call_operand.vmem [shape: f32[8,64], index: 2, kind: input, shape index: {}]   ;;  %s277_s3 = inlined_call_operand.vmem [shape: f32[24,64], index: 3, kind: input, shape index: {}]   ;;  %s278_s4 = inlined_call_operand.vmem [shape: f32[1,64], index: 4, kind: input, shape index: {}]   ;;  %s279_s5 = inlined_call_operand.vmem [shape: f32[64,32], index: 5, kind: input, shape index: {}]   ;;  %s280_s6 = inlined_call_operand.vmem [shape: f32[1,32], index: 6, kind: input, shape index: {}]   ;;  %s281_s7 = inlined_call_operand.hbm [shape: f32[2,40], index: 7, kind: output, shape index: {}]  }
   0x1   :  { %v32_v0 = vld [vmem:[%s277_s3 + $0x10] sm:$0xff]  ;;  %v31_v1 = vld [vmem:[%s277_s3 + $0x8] sm:$0xff]  ;;  %v29_v2 = vld [vmem:[%s276_s2] sm:$0xff] }
   0x2   :  { %50 = vmatpush.msra.mxu0 %v32_v0  ;;  %v27_v3 = vld [vmem:[%s274_s0] sm:$0x3]  ;;  %76 = vmatpush.msra.mxu1 %v29_v2  ;;  %v94_v6 = vld [vmem:[%s279_s5 + $0x38] sm:$0xff]  ;;  %v93_v7 = vld [vmem:[%s279_s5 + $0x30] sm:$0xff] }
   0x3   :  { %v30_v4 = vld [vmem:[%s277_s3] sm:$0xff]  ;;  %125 = vst.msk [vmem:[#allocation2] sm:$0x3] %vm124_vm1, %v27_v3  ;;  %149 = vmatmul.msk.f32.vlgmr.msra.gmra.mxu1 %vm57_vm0, %v27_v3  ;;  %111 = vmatpush.msra.mxu2 %v94_v6 }
   0x4   :  { %v28_v5 = vld [vmem:[%s275_s1] sm:$0x3]  ;;  %51 = vmatpush.msra.mxu0 %v31_v1 }
   0x5   :  { %12 = vsyncpa [#allocation3], 0  ;;  %v92_v8 = vld [vmem:[%s279_s5 + $0x28] sm:$0xff]  ;;  %112 = vmatpush.msra.mxu2 %v93_v7  ;;  %v91_v9 = vld [vmem:[%s279_s5 + $0x20] sm:$0xff]  ;;  %vm99_vm3 = vcmask 523264   ;;  %s182_s29 = smov [#allocation2]  }
   0x6   :  { %52 = vmatpush.msra.mxu0 %v30_v4  ;;  %v90_v10 = vld [vmem:[%s279_s5 + $0x18] sm:$0xff]  ;;  %v89_v11 = vld [vmem:[%s279_s5 + $0x10] sm:$0xff]  ;;  %v88_v12 = vld [vmem:[%s279_s5 + $0x8] sm:$0xff]  ;;  %s137_s30 = sshll.u32 %s182_s29, 4  ;;  %vm130_vm4 = vcmask 320576   ;;  %s138_s30 = int_to_ptr.vmem [resolvable:$true] %s137_s30 }
   0x7   :  { %148 = vmatmul.msk.f32.vlgmr.msra.gmra.mxu0 %vm33_vm2, %v28_v5  ;;  %113 = vmatpush.msra.mxu2 %v92_v8  ;;  %v87_v13 = vld [vmem:[%s279_s5] sm:$0xff]  ;;  %s181_s5 = smov 8  }
   0x8   :  { %v153_v15 = vld [vmem:[%s278_s4] ss:$0 sm:$0xff]  ;;  %s139_s4 = sshll.u32 %s281_s7, 4  ;;  %s140_s4 = int_to_ptr.hbm [resolvable:$true] %s139_s4 }
   0x9   :  { %114 = vmatpush.msra.mxu2 %v91_v9  ;;  %v154_v20 = vld [vmem:[%s280_s6] ss:$0 sm:$0xff] }
   0xb   :  { %115 = vmatpush.msra.mxu2 %v90_v10 }
   0xd   :  { %116 = vmatpush.msra.mxu2 %v89_v11 }
   0xf   :  { %117 = vmatpush.msra.mxu2 %v88_v12 }
  0x11   :  { %118 = vmatpush.msra.mxu2 %v87_v13 }
  0x80   :  { %v78_v14 = vpop.f32.mrf.mxu1 }
  0x84   :  { %v54_v16 = vpop.f32.mrf.mxu0 }
  0x85   :  { %v79_v17 = vadd.f32 %v78_v14, %v54_v16 }
  0x87   :  { %v85_v18 = vadd.f32 %v153_v15, %v79_v17 }
  0x89   :  { %v86_v19 = vmax.f32 %v85_v18, 0.0 }
  0x8b   :  { %150 = vmatmul.msk.f32.vlgmr.msra.gmra.mxu2 %vm99_vm3, %v86_v19 }
 0x10e   :  { %v120_v21 = vpop.f32.mrf.mxu2 }
 0x10f   :  { %v121_v22 = vadd.f32 %v154_v20, %v120_v21 }
 0x111   :  { %v123_v23 = vmax.f32 %v121_v22, 0.0 }
 0x113   :  { %127 = vrot.lane.b32.xlu0 %v123_v23, %s181_s5 }
 0x185   :  { %v128_v24 = vpop.permute.xlu0 %127 }
 0x186   :  { %131 = vst.msk [vmem:[#allocation2] sm:$0x3] %vm130_vm4, %v128_v24 }
 0x187   :  { %142 = dma.vmem_to_hbm [thread:$0]  %s138_s30, 32, %s140_s4, [#allocation3]  }
 0x188   :  { %179 = dma.done.wait [#allocation3], 32  }
 0x189   :  { %180 = vsyncadd [#allocation3], 4294967264 }
 0x18a   :  { %147 = vsyncpa [#allocation3], 1 }

</bundles_post_ra>
